<compile_context>
chip_gen: v7x
topology: tpu7x:2x2x1
jax: 0.10.0
libtpu: 0.0.40
codegen_flags: <defaults>
</compile_context>

<pallas_src>
import functools

import jax
import jax.numpy as jnp
import numpy as np
from jax.experimental import pallas as pl
from jax.experimental.pallas import tpu as pltpu


def _center_loss_kernel(labels_ref, x_ref, centers_ref, out_ref, *,
                        tb, batch, num_classes):
    """One batch tile: gather the labeled center per row via a one-hot MXU
    matmul against the VMEM-resident centers table and emit per-row clamped
    squared distances (rows past the true batch size -> 0)."""
    i = pl.program_id(0)
    base = i * tb

    x = x_ref[...].astype(jnp.float32)                 # (tb, D)
    centers = centers_ref[...].astype(jnp.float32)     # (C, D), resident
    labels = labels_ref[...]                           # (tb, 1) int32

    # One-hot gather of c[labels] on the MXU (exact with HIGHEST precision).
    classes = jax.lax.broadcasted_iota(jnp.int32, (tb, num_classes), 1)
    one_hot = (labels == classes).astype(jnp.float32)  # (tb, C)
    c = jnp.dot(one_hot, centers,
                preferred_element_type=jnp.float32,
                precision=jax.lax.Precision.HIGHEST)   # (tb, D)

    # Fused per-row squared distance: a single cross-lane reduction.
    diff = x - c
    d = jnp.sum(diff * diff, axis=1, keepdims=True)    # (tb, 1)
    d = jnp.clip(d, 1e-12, 1e12)                       # same clamp as torch

    # Mask rows of the (possibly partial) last batch tile; OOB x data is
    # undefined but gets zeroed here.
    row = base + jax.lax.broadcasted_iota(jnp.int32, (tb, 1), 0)
    out_ref[...] = jnp.where(row < batch, d, 0.0)


def center_loss(x, centers, labels):
    """Pallas CenterLoss forward.

    x:       (B, D) float32 / bfloat16
    centers: (C, D) float32 / bfloat16
    labels:  (B,)   integer
    returns: scalar float32 loss (identical semantics to the PyTorch module)
    """
    B, D = x.shape
    C, Dc = centers.shape
    assert D == Dc, "feature dims of x and centers must match"

    labels = labels.astype(jnp.int32)
    x_item = jnp.dtype(x.dtype).itemsize
    c_item = jnp.dtype(centers.dtype).itemsize

    # --- VMEM budget / batch-tile sizing ------------------------------------
    # ~30 MiB working set + 40 MiB scoped limit is safe on v5e / v6e / v7x.
    vmem_budget = 30 * 1024 * 1024
    centers_resident = 2 * C * D * c_item            # (assume double-buffered)
    if jnp.dtype(centers.dtype) != jnp.float32:
        centers_resident += C * D * 4                # in-kernel f32 copy
    # x double-buffer + f32 temporaries (x, c, diff) + one-hot row
    per_row = 2 * D * x_item + 3 * D * 4 + (C + 8) * 4
    # TODO(synk): add an HBM-streamed / DMA-gather fallback for center tables
    # that do not fit in VMEM (not needed for the module's 751 x 2048 default).
    assert centers_resident + 8 * per_row <= vmem_budget, (
        "centers table too large for the VMEM-resident fast path")

    tb_cap = (vmem_budget - centers_resident) // per_row
    tb_cap = max(8, min(2048, (tb_cap // 8) * 8))
    if B >= 8:
        tb = int(min(tb_cap, (B // 8) * 8))          # block never exceeds B
    else:
        tb = B                                       # single block == array dim
    grid = (B + tb - 1) // tb
    bp = grid * tb

    # Only the tiny labels vector is padded; x is never copied or padded.
    labels2d = labels.reshape(B, 1)
    if bp != B:
        labels2d = jnp.pad(labels2d, ((0, bp - B), (0, 0)))

    kernel = functools.partial(
        _center_loss_kernel, tb=tb, batch=B, num_classes=C)

    per_row_dist = pl.pallas_call(
        kernel,
        out_shape=jax.ShapeDtypeStruct((bp, 1), jnp.float32),
        grid_spec=pltpu.PrefetchScalarGridSpec(
            num_scalar_prefetch=0,
            grid=(grid,),
            in_specs=[
                pl.BlockSpec((tb, 1), lambda i: (i, 0)),   # labels tile
                pl.BlockSpec((tb, D), lambda i: (i, 0)),   # x tile
                pl.BlockSpec((C, D), lambda i: (0, 0)),    # centers, VMEM-resident
            ],
            out_specs=pl.BlockSpec((tb, 1), lambda i: (i, 0)),
        ),
        compiler_params=pltpu.CompilerParams(
            dimension_semantics=("parallel",),             # megacore-shardable
            vmem_limit_bytes=40 * 1024 * 1024,
        ),
    )(labels2d, x, centers)

    # Mean over the true batch + the clamp-floor contribution of the (C-1)
    # masked-out zero entries per row in the reference formulation.
    return jnp.sum(per_row_dist) / B + (C - 1) * 1e-12


def center_loss_ref(x, centers, labels):
    """Pure-JAX reference mirroring the PyTorch forward (full distmat + mask)."""
    B = x.shape[0]
    C = centers.shape[0]
    xf = x.astype(jnp.float32)
    cf = centers.astype(jnp.float32)
    distmat = (
        jnp.sum(xf * xf, axis=1, keepdims=True)
        + jnp.sum(cf * cf, axis=1)[None, :]
        - 2.0 * jnp.dot(xf, cf.T, precision=jax.lax.Precision.HIGHEST)
    )
    mask = (labels[:, None] == jnp.arange(C)[None, :]).astype(jnp.float32)
    dist = distmat * mask
    return jnp.sum(jnp.clip(dist, 1e-12, 1e12)) / B


if __name__ == "__main__":
    key = jax.random.PRNGKey(0)

    # Case 1: small module-consistent shapes (batch multiple of 8).
    num_classes, feat_dim, batch = 16, 128, 8
    kx, kc, kl, key = jax.random.split(key, 4)
    centers = jax.random.normal(kc, (num_classes, feat_dim), dtype=jnp.float32)
    x = jax.random.normal(kx, (batch, feat_dim), dtype=jnp.float32)
    labels = jax.random.randint(kl, (batch,), 0, num_classes, dtype=jnp.int32)

    loss = center_loss(x, centers, labels)
    jax.block_until_ready(loss)
    ref = center_loss_ref(x, centers, labels)
    np.testing.assert_allclose(np.asarray(loss), np.asarray(ref),
                               rtol=1e-5, atol=1e-4)

    # Case 2: ragged shapes (batch not a multiple of 8, odd C and D) to
    # exercise the partial-last-block masking path (no x padding).
    num_classes2, feat_dim2, batch2 = 37, 96, 12
    kx2, kc2, kl2, key = jax.random.split(key, 4)
    centers2 = jax.random.normal(kc2, (num_classes2, feat_dim2), dtype=jnp.float32)
    x2 = jax.random.normal(kx2, (batch2, feat_dim2), dtype=jnp.float32)
    labels2 = jax.random.randint(kl2, (batch2,), 0, num_classes2, dtype=jnp.int32)

    loss2 = center_loss(x2, centers2, labels2)
    jax.block_until_ready(loss2)
    ref2 = center_loss_ref(x2, centers2, labels2)
    np.testing.assert_allclose(np.asarray(loss2), np.asarray(ref2),
                               rtol=1e-5, atol=1e-4)

    print("KERNEL_OK")
</pallas_src>

<mosaic_0001>
module attributes {stable_mosaic.version = 11 : i64} {
  func.func @_center_loss_kernel(%arg0: i32, %arg1: memref<8x1xi32, #tpu.memory_space<vmem>>, %arg2: memref<8x128xf32, #tpu.memory_space<vmem>>, %arg3: memref<16x128xf32, #tpu.memory_space<vmem>>, %arg4: memref<8x1xf32, #tpu.memory_space<vmem>>) attributes {dimension_semantics = [#tpu.dimension_semantics<parallel>], iteration_bounds = array<i64: 1>, scalar_prefetch = 0 : i64, scratch_operands = 0 : i64, tpu.core_type = #tpu.core_type<tc>, window_params = [{transform_indices = @transform_0, window_bounds = array<i64: 8, 1>}, {transform_indices = @transform_1, window_bounds = array<i64: 8, 128>}, {pipeline_mode = #tpu.pipeline_mode<synchronous>, transform_indices = @transform_2, window_bounds = array<i64: 16, 128>}, {transform_indices = @transform_3, window_bounds = array<i64: 8, 1>}]} {
    %c8_i32 = arith.constant 8 : i32
    %0 = arith.muli %arg0, %c8_i32 : i32
    %c0 = arith.constant 0 : index
    %c0_0 = arith.constant 0 : index
    %1 = vector.load %arg2[%c0, %c0_0] : memref<8x128xf32, #tpu.memory_space<vmem>>, vector<8x128xf32>
    %c0_1 = arith.constant 0 : index
    %c0_2 = arith.constant 0 : index
    %2 = vector.load %arg3[%c0_1, %c0_2] : memref<16x128xf32, #tpu.memory_space<vmem>>, vector<16x128xf32>
    %c0_3 = arith.constant 0 : index
    %c0_4 = arith.constant 0 : index
    %3 = vector.load %arg1[%c0_3, %c0_4] : memref<8x1xi32, #tpu.memory_space<vmem>>, vector<8x1xi32>
    %4 = tpu.iota {dimensions = array<i32: 1>} : vector<8x16xi32>
    %5 = vector.broadcast %3 : vector<8x1xi32> to vector<8x16xi32>
    %6 = arith.cmpi eq, %5, %4 : vector<8x16xi32>
    %7 = arith.extui %6 : vector<8x16xi1> to vector<8x16xi32>
    %8 = arith.sitofp %7 : vector<8x16xi32> to vector<8x16xf32>
    %cst = arith.constant dense<0.000000e+00> : vector<8x128xf32>
    %9 = tpu.matmul %8, %2, %cst {dimension_numbers = #tpu.dot_dimension_numbers<[1], [0], [0], [1], [0, 0, 1, 1], [], []>, precision = #tpu.contract_precision<fp32>} : vector<8x16xf32>, vector<16x128xf32>, vector<8x128xf32> -> vector<8x128xf32>
    %10 = arith.subf %1, %9 : vector<8x128xf32>
    %11 = arith.mulf %10, %10 : vector<8x128xf32>
    %cst_5 = arith.constant dense<0.000000e+00> : vector<8xf32>
    %12 = vector.multi_reduction <add>, %11, %cst_5 [1] : vector<8x128xf32> to vector<8xf32>
    %13 = vector.shape_cast %12 : vector<8xf32> to vector<8x1xf32>
    %cst_6 = arith.constant 9.99999996E-13 : f32
    %cst_7 = arith.constant 9.99999995E+11 : f32
    %14 = vector.broadcast %cst_6 : f32 to vector<8x1xf32>
    %15 = arith.maximumf %14, %13 : vector<8x1xf32>
    %16 = vector.broadcast %cst_7 : f32 to vector<8x1xf32>
    %17 = arith.minimumf %16, %15 : vector<8x1xf32>
    %18 = tpu.iota {dimensions = array<i32: 0>} : vector<8x1xi32>
    %19 = vector.broadcast %0 : i32 to vector<8x1xi32>
    %20 = arith.addi %19, %18 : vector<8x1xi32>
    %c8_i32_8 = arith.constant 8 : i32
    %21 = vector.broadcast %c8_i32_8 : i32 to vector<8x1xi32>
    %22 = arith.cmpi slt, %20, %21 : vector<8x1xi32>
    %cst_9 = arith.constant 0.000000e+00 : f32
    %23 = vector.broadcast %cst_9 : f32 to vector<8x1xf32>
    %24 = arith.select %22, %17, %23 : vector<8x1xi1>, vector<8x1xf32>
    %c0_10 = arith.constant 0 : index
    %c0_11 = arith.constant 0 : index
    %25 = vector.load %arg4[%c0_10, %c0_11] : memref<8x1xf32, #tpu.memory_space<vmem>>, vector<8x1xf32>
    tpu.vector_store %arg4[%c0_10, %c0_11], %24 {strides = array<i32>} : memref<8x1xf32, #tpu.memory_space<vmem>>, vector<8x1xf32>,
    return
  }
  func.func @transform_0(%arg0: i32) -> (i32, i32) {
    %c0_i32 = arith.constant 0 : i32
    %c0_i32_0 = arith.constant 0 : i32
    return %arg0, %c0_i32 : i32, i32
  }
  func.func @transform_1(%arg0: i32) -> (i32, i32) {
    %c0_i32 = arith.constant 0 : i32
    %c0_i32_0 = arith.constant 0 : i32
    return %arg0, %c0_i32 : i32, i32
  }
  func.func @transform_2(%arg0: i32) -> (i32, i32) {
    %c0_i32 = arith.constant 0 : i32
    %c0_i32_0 = arith.constant 0 : i32
    %c0_i32_1 = arith.constant 0 : i32
    return %c0_i32, %c0_i32_0 : i32, i32
  }
  func.func @transform_3(%arg0: i32) -> (i32, i32) {
    %c0_i32 = arith.constant 0 : i32
    %c0_i32_0 = arith.constant 0 : i32
    return %arg0, %c0_i32 : i32, i32
  }
}

</mosaic_0001>

<bundles_post_ra>
// kernel: tpu_custom_call.1
= control target key start
LH: loop header
LB: loop body
LE: loop exit
PB: predicated region body
PF: predicated region fallthrough
CT: control target
= control target key end

     0   :  { %8 = vsyncpa [#allocation3], 0  ;;  %s642_s12 = smov [#allocation2]   ;;  %s701_s0 = inlined_call_operand.vmem [shape: s32[8,1], index: 0, kind: input, shape index: {}]   ;;  %s702_s1 = inlined_call_operand.hbm [shape: f32[8,128], index: 1, kind: input, shape index: {}]   ;;  %s703_s2 = inlined_call_operand.vmem [shape: f32[16,128], index: 2, kind: input, shape index: {}]   ;;  %s704_s3 = inlined_call_operand.vmem [shape: f32[8,1], index: 3, kind: output, shape index: {}]  }
   0x1   :  { %s17_s13 = sshll.u32 %s642_s12, 4  ;;  %s618_s16 = scalar_lea.hbm %s702_s1, 128  ;;  %s18_s13 = int_to_ptr.vmem [resolvable:$true] %s17_s13 }
   0x2   :  { %p619_p0 = scmp.ne.s32.totalorder %s702_s1, %s618_s16  ;;  %p622_p1 = scmp.lt.u32.totalorder %s618_s16, %s702_s1 }
   0x4   :  { %p624_p2 = pnand %p622_p1, %p619_p0 }
   0x6   :  { %627 = shalt.err (!%p624_p2)
}
   0x7   :  { %s628_s21 = scalar_lea.vmem %s18_s13, 128  ;;  %p633_p4 = scmp.lt.s32.totalorder %s18_s13, %s18_s13 }
   0x8   :  { %p629_p3 = scmp.ne.s32.totalorder %s18_s13, %s628_s21  ;;  %p634_p5 = scmp.lt.s32.totalorder %s628_s21, %s628_s21 }
   0xa   :  { %p635_p6 = por %p634_p5, %p633_p4 }
   0xc   :  { %p636_p7 = pnand %p635_p6, %p629_p3 }
   0xe   :  { %639 = shalt.err (!%p636_p7)
}
   0xf   :  { %20 = dma.hbm_to_vmem [thread:$0]  %s702_s1, 128, %s18_s13, [#allocation3]  }
  0x10   :  { %640 = dma.done.wait [#allocation3], 128  }
  0x11   :  { %641 = vsyncadd [#allocation3], 4294967168  ;;  %v643_v0 = vmov 0   ;;  %v30_v1 = vld [vmem:[%s701_s0] sm:$0xff]  ;;  %v29_v3 = vld [vmem:[%s703_s2 + $0x8] sm:$0xff]  ;;  %v644_v7 = vmov 0.0|0.0   ;;  %v31_v20 = vlaneseq }
  0x12   :  { %617 = vset.pattern.permute.xlu0 %v643_v0  ;;  %v28_v2 = vld [vmem:[%s703_s2] sm:$0xff]  ;;  %v47_v5 = vand.u32 4294901760, %v29_v3  ;;  %594 = vmatprep.subr.bf16.mxu0 %v644_v7  ;;  %vm645_vm0 = vmmov 0   ;;  %v646_v10 = vmov 0.0   ;;  %vm39_vm1 = vcmask 130048   ;;  %v27_v32 = vld [vmem:[#allocation2] sm:$0xff] }
  0x13   :  { %34 = vperm.xlu0 %617, %v30_v1   ;;  %v44_v4 = vand.u32 4294901760, %v28_v2  ;;  %585 = vmatprep.subr.bf16.mxu1 %v644_v7  ;;  %v32_v21 = vand.u32 127, %v31_v20  ;;  %vm514_vm3 = vcmask 7168  }
  0x14   :  { %v129_v9 = vsub.f32 %v29_v3, %v47_v5  ;;  %568 = vmatprep.mubr.msk.f32.mxu0 %vm645_vm0, %v646_v10  ;;  %547 = vmatprep.mubr.msk.f32.mxu1 %vm645_vm0, %v646_v10 }
  0x15   :  { %v586_v6 = vpack.c.bf16 %v47_v5, %v44_v4  ;;  %v122_v8 = vsub.f32 %v28_v2, %v44_v4 }
  0x16   :  { %v130_v12 = vand.u32 4294901760, %v129_v9 }
  0x17   :  { %596 = vmatpush3.bf16.msra.mxu0 %v586_v6  ;;  %587 = vmatpush3.bf16.msra.mxu1 %v586_v6  ;;  %v123_v11 = vand.u32 4294901760, %v122_v8  ;;  %v592_v19 = vpack.c.bf16 %v129_v9, %v122_v8 }
  0x18   :  { %588 = vmatprep.subr.bf16.mxu1 %v644_v7  ;;  %597 = vmatprep.subr.bf16.mxu0 %v644_v7  ;;  %v131_v14 = vsub.f32 %v129_v9, %v130_v12 }
  0x19   :  { %v124_v13 = vsub.f32 %v122_v8, %v123_v11  ;;  %v598_v15 = vpack.c.bf16 %v130_v12, %v123_v11 }
  0x1a   :  { %v132_v17 = vand.u32 4294901760, %v131_v14 }
  0x1b   :  { %v125_v16 = vand.u32 4294901760, %v124_v13 }
  0x1d   :  { %v589_v18 = vpack.c.bf16 %v132_v17, %v125_v16 }
  0x92   :  { %v35_v22 = vpop.permute.xlu0 %34 }
  0x93   :  { %vm36_vm2 = vcmp.eq.s32.totalorder %v35_v22, %v32_v21 }
  0x94   :  { %v521_v23 = vsel %vm36_vm2, 1.0, %v646_v10 }
  0x95   :  { %v41_v24 = vsel %vm39_vm1, %v521_v23, 0 }
  0x96   :  { %v111_v25 = vsub.f32 %v41_v24, %v41_v24 }
  0x98   :  { %v112_v26 = vand.u32 4294901760, %v111_v25 }
  0x9a   :  { %569 = vmatmul.mubr.f32.vlgmr.msra.gmra.mrb[0].mxu0 %v112_v26  ;;  %v113_v27 = vsub.f32 %v111_v25, %v112_v26 }
  0x9b   :  { %599 = vmatpush3.bf16.msra.mxu0 %v598_v15  ;;  %575 = vmatprep.mubr.msk.f32.mxu0 %vm645_vm0, %v646_v10 }
  0x9c   :  { %v114_v28 = vand.u32 4294901760, %v113_v27  ;;  %600 = vmatprep.subr.bf16.mxu0 %v644_v7 }
  0x9e   :  { %548 = vmatmul.mubr.f32.vlgmr.msra.gmra.mrb[0].mxu1 %v114_v28 }
  0x9f   :  { %590 = vmatpush3.bf16.msra.mxu1 %v589_v18  ;;  %554 = vmatprep.mubr.msk.f32.mxu1 %vm645_vm0, %v646_v10 }
  0xa0   :  { %591 = vmatprep.subr.bf16.mxu1 %v644_v7 }
  0xa2   :  { %576 = vmatmul.mubr.msk.f32.vlgmr.msra.gmra.mrb[0].mxu0 %vm39_vm1, %v521_v23 }
  0xa3   :  { %602 = vmatpush3.bf16.msra.mxu0 %v586_v6  ;;  %582 = vmatprep.mubr.msk.f32.mxu0 %vm645_vm0, %v646_v10 }
  0xa6   :  { %555 = vmatmul.mubr.msk.f32.vlgmr.msra.gmra.mrb[0].mxu1 %vm39_vm1, %v521_v23 }
  0xa7   :  { %593 = vmatpush3.bf16.msra.mxu1 %v592_v19  ;;  %561 = vmatprep.mubr.msk.f32.mxu1 %vm645_vm0, %v646_v10 }
  0xaa   :  { %583 = vmatmul.mubr.msk.f32.vlgmr.msra.gmra.mrb[0].mxu0 %vm39_vm1, %v521_v23 }
  0xae   :  { %562 = vmatmul.mubr.f32.vlgmr.msra.gmra.mrb[0].mxu1 %v111_v25 }
 0x17d   :  { %v498_v29 = vpop.f32.mrb[0].mxu0 }
 0x17e   :  { %v584_v30 = vpop.f32.mrb[1].mxu0 }
 0x181   :  { %v273_v31 = vpop.f32.mrb[0].mxu1 }
 0x182   :  { %v603_v33 = vadd.f32 %v498_v29, %v273_v31  ;;  %v563_v34 = vpop.f32.mrb[1].mxu1 }
 0x184   :  { %v502_v35 = vsub.f32 %v27_v32, %v603_v33 }
 0x186   :  { %v503_v36 = vmul.f32 %v502_v35, %v502_v35 }
 0x188   :  { %504 = vadd.xlane.f32.xlu0 %v503_v36 }
 0x215   :  { %v505_v37 = vpop.xlane.xlu0 %504 }
 0x216   :  { %v506_v38 = vmax.f32 %v505_v37, 1e-12 }
 0x218   :  { %v507_v39 = vmin.f32 %v506_v38, 1e+12 }
 0x21a   :  { %515 = vst.msk [vmem:[%s704_s3] sm:$0xff] %vm514_vm3, %v507_v39 }
 0x21b   :  { %520 = vsyncpa [#allocation3], 1 }

</bundles_post_ra>
